<compile_context>
chip_gen: v7x
topology: tpu7x:2x2x1
jax: 0.10.0
libtpu: 0.0.40
codegen_flags: <defaults>
</compile_context>

<pallas_src>
import numpy as np
import jax
import jax.numpy as jnp
from jax.experimental import pallas as pl
from jax.experimental.pallas import tpu as pltpu

NEG_SLOPE = 0.01
EPS = 1e-5
ROW_PAD = 16  # interior row offset in the scratch; aligned for f32 and bf16 tiles


# ----------------------------------------------------------------------------
# Kernel
# ----------------------------------------------------------------------------
def _fused_stack_kernel(x_ref, w_ref, b_ref, o_ref, xpad_ref):
    """All num_convs blocks for one batch element, intermediates kept in VMEM.

    x_ref   : (1, H, W*Cp) bf16     lane-dense input activation
    w_ref   : (3*L, W*Cp, W*Cp) bf16  per-(layer, ky) shifted block-diag weights
    b_ref   : (L, 1, W*Cp) f32      folded (conv bias + BN) bias, tiled across W
    o_ref   : (1, H, W*Cp) f32      lane-dense output activation
    xpad_ref: (2*ROW_PAD+H, W*Cp) bf16 VMEM activation scratch with zero halo rows
    """
    H = o_ref.shape[1]
    WCp = o_ref.shape[2]
    L = b_ref.shape[0]

    # Zero only the two halo rows (rows ROW_PAD-1 and ROW_PAD+H); every other
    # scratch row is either the interior (overwritten below) or never read.
    zrow = jnp.zeros((1, WCp), xpad_ref.dtype)
    xpad_ref[ROW_PAD - 1:ROW_PAD, :] = zrow
    xpad_ref[ROW_PAD + H:ROW_PAD + H + 1, :] = zrow
    # Interior store is tile-aligned (offset 16, length H).
    xpad_ref[ROW_PAD:ROW_PAD + H, :] = x_ref[0]

    for l in range(L):                       # static, unrolled (num_convs is small)
        # 3 row taps -> 3 full-K bf16 MXU matmuls, f32 accumulate.
        acc = jnp.dot(xpad_ref[ROW_PAD - 1:ROW_PAD - 1 + H, :], w_ref[3 * l + 0],
                      preferred_element_type=jnp.float32)
        acc = acc + jnp.dot(xpad_ref[ROW_PAD:ROW_PAD + H, :], w_ref[3 * l + 1],
                            preferred_element_type=jnp.float32)
        acc = acc + jnp.dot(xpad_ref[ROW_PAD + 1:ROW_PAD + 1 + H, :], w_ref[3 * l + 2],
                            preferred_element_type=jnp.float32)
        acc = acc + b_ref[l]                               # folded bias + BN shift
        acc = jnp.where(acc >= 0, acc, NEG_SLOPE * acc)    # LeakyReLU(0.01)
        if l + 1 < L:
            # Next block's input stays in VMEM; aligned unmasked store.
            xpad_ref[ROW_PAD:ROW_PAD + H, :] = acc.astype(xpad_ref.dtype)
        else:
            o_ref[0] = acc.astype(o_ref.dtype)


# ----------------------------------------------------------------------------
# Host-side parameter folding / packing
# ----------------------------------------------------------------------------
def _round_up(v, m):
    return (v + m - 1) // m * m


def _shift_mask(W):
    """sm[kx, s, w] = 1 iff s == w + kx - 1  (folds the kx taps and the
    W-direction zero padding into the weight matrix)."""
    sm = np.zeros((3, W, W), np.float32)
    for kx in range(3):
        for w in range(W):
            s = w + kx - 1
            if 0 <= s < W:
                sm[kx, s, w] = 1.0
    return jnp.asarray(sm)


def _pack_params(params_list, W, Cp):
    """Fold eval-mode BN into conv weight/bias, pad channels to Cp, and build
    per-(layer, ky) shifted block-diagonal weights of shape (W*Cp, W*Cp)."""
    sm = _shift_mask(W)
    w_all, b_all = [], []
    for p in params_list:
        cout, cin = p["w_oihw"].shape[0], p["w_oihw"].shape[1]
        scale = p["gamma"] / jnp.sqrt(p["running_var"] + EPS)
        shift = p["beta"] - p["running_mean"] * scale
        # OIHW -> HWIO, BN scale folded into the output channels (f32 math).
        w_hwio = jnp.transpose(p["w_oihw"], (2, 3, 1, 0)) * scale      # (3,3,cin,cout)
        b_fold = p["bias"] * scale + shift                             # (cout,)
        # Zero-pad channels to the common width Cp (zeros are exact no-ops).
        w_pad = jnp.zeros((3, 3, Cp, Cp), jnp.float32).at[:, :, :cin, :cout].set(w_hwio)
        b_pad = jnp.zeros((Cp,), jnp.float32).at[:cout].set(b_fold)
        # Wc[ky, s*Cp+ci, w*Cp+co] = sum_kx sm[kx,s,w] * w_pad[ky,kx,ci,co]
        wc = jnp.einsum("xsw,yxio->ysiwo", sm, w_pad).reshape(3, W * Cp, W * Cp)
        w_all.append(wc)
        b_all.append(jnp.tile(b_pad, W)[None, :])                      # (1, W*Cp)
    w = jnp.concatenate(w_all, axis=0).astype(jnp.bfloat16)            # (3L, WCp, WCp)
    b = jnp.stack(b_all, axis=0)                                       # (L, 1, WCp) f32
    return w, b


# ----------------------------------------------------------------------------
# Public forward
# ----------------------------------------------------------------------------
@jax.jit
def stacked_conv_layers_forward(x_nchw, params_list):
    """Forward pass of StackedConvLayers (eval mode). Input/output layout: NCHW."""
    N, Cin, H, W = x_nchw.shape
    Cout = params_list[0]["w_oihw"].shape[0]
    L = len(params_list)
    Cp = _round_up(max(Cin, Cout), 8)        # common padded channel width
    WCp = W * Cp

    w_all, b_all = _pack_params(params_list, W, Cp)      # bf16 weights, f32 bias

    # NCHW -> lane-dense bf16 (N, H, W*Cp) with channels zero-padded to Cp.
    x_nhwc = jnp.transpose(x_nchw, (0, 2, 3, 1)).astype(jnp.bfloat16)
    x_ld = jnp.zeros((N, H, W, Cp), jnp.bfloat16).at[..., :Cin].set(x_nhwc)
    x_ld = x_ld.reshape(N, H, WCp)

    flops = N * L * (3 * 2 * H * WCp * WCp + 5 * H * WCp)   # matmuls + bias/lrelu
    bytes_accessed = (
        N * H * WCp * 2            # bf16 input activation
        + 3 * L * WCp * WCp * 2    # bf16 folded weights (fetched once per core)
        + L * WCp * 4              # f32 folded bias
        + N * H * WCp * 4          # f32 output activation
    )

    out_ld = pl.pallas_call(
        _fused_stack_kernel,
        out_shape=jax.ShapeDtypeStruct((N, H, WCp), jnp.float32),
        grid=(N,),
        in_specs=[
            pl.BlockSpec((1, H, WCp), lambda n: (n, 0, 0)),
            # Grid-invariant operands: single pipeline buffer (no redundant 2x VMEM).
            pl.BlockSpec((3 * L, WCp, WCp), lambda n: (0, 0, 0),
                         pipeline_mode=pl.Buffered(1)),
            pl.BlockSpec((L, 1, WCp), lambda n: (0, 0, 0),
                         pipeline_mode=pl.Buffered(1)),
        ],
        out_specs=pl.BlockSpec((1, H, WCp), lambda n: (n, 0, 0)),
        scratch_shapes=[pltpu.VMEM((2 * ROW_PAD + H, WCp), jnp.bfloat16)],
        compiler_params=pltpu.CompilerParams(
            dimension_semantics=("parallel",)    # batch shards across TCs on v7x
        ),
        cost_estimate=pl.CostEstimate(
            flops=int(flops), transcendentals=0, bytes_accessed=int(bytes_accessed)),
    )(x_ld, w_all, b_all)

    out = out_ld.reshape(N, H, W, Cp)[..., :Cout].astype(x_nchw.dtype)
    return jnp.transpose(out, (0, 3, 1, 2))      # back to NCHW


# ----------------------------------------------------------------------------
# Parameter init (mirrors StackedConvLayers.__init__ shapes) and reference
# ----------------------------------------------------------------------------
def make_stacked_conv_params(key, input_channels, output_channels, num_convs):
    params = []
    cin = input_channels
    for _ in range(num_convs):
        key, kw, kb, kg, kbe, km, kv = jax.random.split(key, 7)
        # PyTorch Conv2d weight layout is (Cout, Cin, 3, 3).
        w_oihw = jax.random.normal(kw, (output_channels, cin, 3, 3), jnp.float32) * 0.1
        bias = jax.random.normal(kb, (output_channels,), jnp.float32) * 0.1
        gamma = 1.0 + 0.1 * jax.random.normal(kg, (output_channels,), jnp.float32)
        beta = 0.1 * jax.random.normal(kbe, (output_channels,), jnp.float32)
        running_mean = 0.1 * jax.random.normal(km, (output_channels,), jnp.float32)
        running_var = 1.0 + 0.1 * jax.random.uniform(kv, (output_channels,), jnp.float32)
        params.append(dict(
            w_oihw=w_oihw, bias=bias, gamma=gamma, beta=beta,
            running_mean=running_mean, running_var=running_var,
        ))
        cin = output_channels
    return params


def _reference_forward(x_nchw, params_list):
    """Pure-JAX/XLA f32 reference (eval-mode PyTorch semantics) for validation."""
    x = x_nchw
    for p in params_list:
        y = jax.lax.conv_general_dilated(
            x, p["w_oihw"], window_strides=(1, 1), padding="SAME",
            dimension_numbers=("NCHW", "OIHW", "NCHW"),
        )
        y = y + p["bias"][None, :, None, None]
        y = (y - p["running_mean"][None, :, None, None]) / jnp.sqrt(
            p["running_var"][None, :, None, None] + EPS
        ) * p["gamma"][None, :, None, None] + p["beta"][None, :, None, None]
        x = jnp.where(y >= 0, y, NEG_SLOPE * y)
    return x


if __name__ == "__main__":
    key = jax.random.PRNGKey(0)
    kx, kp = jax.random.split(key)

    # StackedConvLayers(input_feature_channels=4, output_feature_channels=8,
    #                   num_convs=2, first_stride=None) with default conv_kwargs.
    N, Cin, Cout, H, W = 2, 4, 8, 16, 16
    num_convs = 2

    x = jax.random.normal(kx, (N, Cin, H, W), jnp.float32)
    params = make_stacked_conv_params(kp, Cin, Cout, num_convs)

    out = stacked_conv_layers_forward(x, params)
    out = jax.block_until_ready(out)

    ref = _reference_forward(x, params)
    assert out.shape == (N, Cout, H, W), out.shape
    # bf16 matmul operands (f32 accumulate) -> tolerance loosened vs f32 reference.
    assert jnp.allclose(out, ref, atol=5e-2, rtol=5e-2), (
        float(jnp.max(jnp.abs(out - ref)))
    )

    print("KERNEL_OK")
</pallas_src>

<mosaic_0001>
module attributes {stable_mosaic.version = 11 : i64} {
  func.func @_fused_stack_kernel(%arg0: i32, %arg1: memref<1x16x128xbf16, #tpu.memory_space<vmem>>, %arg2: memref<6x128x128xbf16, #tpu.memory_space<vmem>>, %arg3: memref<2x1x128xf32, #tpu.memory_space<vmem>>, %arg4: memref<1x16x128xf32, #tpu.memory_space<vmem>>, %arg5: memref<48x128xbf16, #tpu.memory_space<vmem>>) attributes {dimension_semantics = [#tpu.dimension_semantics<parallel>], iteration_bounds = array<i64: 2>, scalar_prefetch = 0 : i64, scratch_operands = 1 : i64, tpu.core_type = #tpu.core_type<tc>, window_params = [{transform_indices = @transform_0, window_bounds = array<i64: 1, 16, 128>}, {pipeline_mode = #tpu.pipeline_mode<synchronous>, transform_indices = @transform_1, window_bounds = array<i64: 6, 128, 128>}, {pipeline_mode = #tpu.pipeline_mode<synchronous>, transform_indices = @transform_2, window_bounds = array<i64: 2, 1, 128>}, {transform_indices = @transform_3, window_bounds = array<i64: 1, 16, 128>}]} {
    %cst = arith.constant 0.000000e+00 : bf16
    %0 = vector.broadcast %cst : bf16 to vector<1x128xbf16>
    %c15 = arith.constant 15 : index
    %c0 = arith.constant 0 : index
    %1 = vector.load %arg5[%c15, %c0] : memref<48x128xbf16, #tpu.memory_space<vmem>>, vector<1x128xbf16>
    tpu.vector_store %arg5[%c15, %c0], %0 {strides = array<i32>} : memref<48x128xbf16, #tpu.memory_space<vmem>>, vector<1x128xbf16>,
    %c32 = arith.constant 32 : index
    %c0_0 = arith.constant 0 : index
    %2 = vector.load %arg5[%c32, %c0_0] : memref<48x128xbf16, #tpu.memory_space<vmem>>, vector<1x128xbf16>
    tpu.vector_store %arg5[%c32, %c0_0], %0 {strides = array<i32>} : memref<48x128xbf16, #tpu.memory_space<vmem>>, vector<1x128xbf16>,
    %c0_1 = arith.constant 0 : index
    %c0_2 = arith.constant 0 : index
    %c0_3 = arith.constant 0 : index
    %3 = vector.load %arg1[%c0_1, %c0_2, %c0_3] : memref<1x16x128xbf16, #tpu.memory_space<vmem>>, vector<1x16x128xbf16>
    %4 = vector.shape_cast %3 : vector<1x16x128xbf16> to vector<16x128xbf16>
    %c16 = arith.constant 16 : index
    %c0_4 = arith.constant 0 : index
    %5 = vector.load %arg5[%c16, %c0_4] : memref<48x128xbf16, #tpu.memory_space<vmem>>, vector<16x128xbf16>
    tpu.vector_store %arg5[%c16, %c0_4], %4 {strides = array<i32>} : memref<48x128xbf16, #tpu.memory_space<vmem>>, vector<16x128xbf16>,
    %c15_5 = arith.constant 15 : index
    %c0_6 = arith.constant 0 : index
    %6 = vector.load %arg5[%c15_5, %c0_6] : memref<48x128xbf16, #tpu.memory_space<vmem>>, vector<16x128xbf16>
    %c0_7 = arith.constant 0 : index
    %c0_8 = arith.constant 0 : index
    %c0_9 = arith.constant 0 : index
    %7 = vector.load %arg2[%c0_7, %c0_8, %c0_9] : memref<6x128x128xbf16, #tpu.memory_space<vmem>>, vector<1x128x128xbf16>
    %8 = vector.shape_cast %7 : vector<1x128x128xbf16> to vector<128x128xbf16>
    %cst_10 = arith.constant dense<0.000000e+00> : vector<16x128xf32>
    %9 = tpu.matmul %6, %8, %cst_10 {dimension_numbers = #tpu.dot_dimension_numbers<[1], [0], [0], [1], [0, 0, 1, 1], [], []>} : vector<16x128xbf16>, vector<128x128xbf16>, vector<16x128xf32> -> vector<16x128xf32>
    %c16_11 = arith.constant 16 : index
    %c0_12 = arith.constant 0 : index
    %10 = vector.load %arg5[%c16_11, %c0_12] : memref<48x128xbf16, #tpu.memory_space<vmem>>, vector<16x128xbf16>
    %c1 = arith.constant 1 : index
    %c0_13 = arith.constant 0 : index
    %c0_14 = arith.constant 0 : index
    %11 = vector.load %arg2[%c1, %c0_13, %c0_14] : memref<6x128x128xbf16, #tpu.memory_space<vmem>>, vector<1x128x128xbf16>
    %12 = vector.shape_cast %11 : vector<1x128x128xbf16> to vector<128x128xbf16>
    %cst_15 = arith.constant dense<0.000000e+00> : vector<16x128xf32>
    %13 = tpu.matmul %10, %12, %cst_15 {dimension_numbers = #tpu.dot_dimension_numbers<[1], [0], [0], [1], [0, 0, 1, 1], [], []>} : vector<16x128xbf16>, vector<128x128xbf16>, vector<16x128xf32> -> vector<16x128xf32>
    %14 = arith.addf %9, %13 : vector<16x128xf32>
    %c17 = arith.constant 17 : index
    %c0_16 = arith.constant 0 : index
    %15 = vector.load %arg5[%c17, %c0_16] : memref<48x128xbf16, #tpu.memory_space<vmem>>, vector<16x128xbf16>
    %c2 = arith.constant 2 : index
    %c0_17 = arith.constant 0 : index
    %c0_18 = arith.constant 0 : index
    %16 = vector.load %arg2[%c2, %c0_17, %c0_18] : memref<6x128x128xbf16, #tpu.memory_space<vmem>>, vector<1x128x128xbf16>
    %17 = vector.shape_cast %16 : vector<1x128x128xbf16> to vector<128x128xbf16>
    %cst_19 = arith.constant dense<0.000000e+00> : vector<16x128xf32>
    %18 = tpu.matmul %15, %17, %cst_19 {dimension_numbers = #tpu.dot_dimension_numbers<[1], [0], [0], [1], [0, 0, 1, 1], [], []>} : vector<16x128xbf16>, vector<128x128xbf16>, vector<16x128xf32> -> vector<16x128xf32>
    %19 = arith.addf %14, %18 : vector<16x128xf32>
    %c0_20 = arith.constant 0 : index
    %c0_21 = arith.constant 0 : index
    %c0_22 = arith.constant 0 : index
    %20 = vector.load %arg3[%c0_20, %c0_21, %c0_22] : memref<2x1x128xf32, #tpu.memory_space<vmem>>, vector<1x1x128xf32>
    %21 = vector.shape_cast %20 : vector<1x1x128xf32> to vector<1x128xf32>
    %22 = vector.broadcast %21 : vector<1x128xf32> to vector<16x128xf32>
    %23 = arith.addf %19, %22 : vector<16x128xf32>
    %cst_23 = arith.constant 0.000000e+00 : f32
    %24 = vector.broadcast %cst_23 : f32 to vector<16x128xf32>
    %25 = arith.cmpf oge, %23, %24 : vector<16x128xf32>
    %cst_24 = arith.constant 0.00999999977 : f32
    %26 = vector.broadcast %cst_24 : f32 to vector<16x128xf32>
    %27 = arith.mulf %26, %23 : vector<16x128xf32>
    %28 = arith.select %25, %23, %27 : vector<16x128xi1>, vector<16x128xf32>
    %29 = arith.truncf %28 : vector<16x128xf32> to vector<16x128xbf16>
    %c16_25 = arith.constant 16 : index
    %c0_26 = arith.constant 0 : index
    %30 = vector.load %arg5[%c16_25, %c0_26] : memref<48x128xbf16, #tpu.memory_space<vmem>>, vector<16x128xbf16>
    tpu.vector_store %arg5[%c16_25, %c0_26], %29 {strides = array<i32>} : memref<48x128xbf16, #tpu.memory_space<vmem>>, vector<16x128xbf16>,
    %c15_27 = arith.constant 15 : index
    %c0_28 = arith.constant 0 : index
    %31 = vector.load %arg5[%c15_27, %c0_28] : memref<48x128xbf16, #tpu.memory_space<vmem>>, vector<16x128xbf16>
    %c3 = arith.constant 3 : index
    %c0_29 = arith.constant 0 : index
    %c0_30 = arith.constant 0 : index
    %32 = vector.load %arg2[%c3, %c0_29, %c0_30] : memref<6x128x128xbf16, #tpu.memory_space<vmem>>, vector<1x128x128xbf16>
    %33 = vector.shape_cast %32 : vector<1x128x128xbf16> to vector<128x128xbf16>
    %cst_31 = arith.constant dense<0.000000e+00> : vector<16x128xf32>
    %34 = tpu.matmul %31, %33, %cst_31 {dimension_numbers = #tpu.dot_dimension_numbers<[1], [0], [0], [1], [0, 0, 1, 1], [], []>} : vector<16x128xbf16>, vector<128x128xbf16>, vector<16x128xf32> -> vector<16x128xf32>
    %c16_32 = arith.constant 16 : index
    %c0_33 = arith.constant 0 : index
    %35 = vector.load %arg5[%c16_32, %c0_33] : memref<48x128xbf16, #tpu.memory_space<vmem>>, vector<16x128xbf16>
    %c4 = arith.constant 4 : index
    %c0_34 = arith.constant 0 : index
    %c0_35 = arith.constant 0 : index
    %36 = vector.load %arg2[%c4, %c0_34, %c0_35] : memref<6x128x128xbf16, #tpu.memory_space<vmem>>, vector<1x128x128xbf16>
    %37 = vector.shape_cast %36 : vector<1x128x128xbf16> to vector<128x128xbf16>
    %cst_36 = arith.constant dense<0.000000e+00> : vector<16x128xf32>
    %38 = tpu.matmul %35, %37, %cst_36 {dimension_numbers = #tpu.dot_dimension_numbers<[1], [0], [0], [1], [0, 0, 1, 1], [], []>} : vector<16x128xbf16>, vector<128x128xbf16>, vector<16x128xf32> -> vector<16x128xf32>
    %39 = arith.addf %34, %38 : vector<16x128xf32>
    %c17_37 = arith.constant 17 : index
    %c0_38 = arith.constant 0 : index
    %40 = vector.load %arg5[%c17_37, %c0_38] : memref<48x128xbf16, #tpu.memory_space<vmem>>, vector<16x128xbf16>
    %c5 = arith.constant 5 : index
    %c0_39 = arith.constant 0 : index
    %c0_40 = arith.constant 0 : index
    %41 = vector.load %arg2[%c5, %c0_39, %c0_40] : memref<6x128x128xbf16, #tpu.memory_space<vmem>>, vector<1x128x128xbf16>
    %42 = vector.shape_cast %41 : vector<1x128x128xbf16> to vector<128x128xbf16>
    %cst_41 = arith.constant dense<0.000000e+00> : vector<16x128xf32>
    %43 = tpu.matmul %40, %42, %cst_41 {dimension_numbers = #tpu.dot_dimension_numbers<[1], [0], [0], [1], [0, 0, 1, 1], [], []>} : vector<16x128xbf16>, vector<128x128xbf16>, vector<16x128xf32> -> vector<16x128xf32>
    %44 = arith.addf %39, %43 : vector<16x128xf32>
    %c1_42 = arith.constant 1 : index
    %c0_43 = arith.constant 0 : index
    %c0_44 = arith.constant 0 : index
    %45 = vector.load %arg3[%c1_42, %c0_43, %c0_44] : memref<2x1x128xf32, #tpu.memory_space<vmem>>, vector<1x1x128xf32>
    %46 = vector.shape_cast %45 : vector<1x1x128xf32> to vector<1x128xf32>
    %47 = vector.broadcast %46 : vector<1x128xf32> to vector<16x128xf32>
    %48 = arith.addf %44, %47 : vector<16x128xf32>
    %cst_45 = arith.constant 0.000000e+00 : f32
    %49 = vector.broadcast %cst_45 : f32 to vector<16x128xf32>
    %50 = arith.cmpf oge, %48, %49 : vector<16x128xf32>
    %cst_46 = arith.constant 0.00999999977 : f32
    %51 = vector.broadcast %cst_46 : f32 to vector<16x128xf32>
    %52 = arith.mulf %51, %48 : vector<16x128xf32>
    %53 = arith.select %50, %48, %52 : vector<16x128xi1>, vector<16x128xf32>
    %c0_47 = arith.constant 0 : index
    %c0_48 = arith.constant 0 : index
    %c0_49 = arith.constant 0 : index
    %54 = vector.load %arg4[%c0_47, %c0_48, %c0_49] : memref<1x16x128xf32, #tpu.memory_space<vmem>>, vector<1x16x128xf32>
    %55 = vector.shape_cast %54 : vector<1x16x128xf32> to vector<16x128xf32>
    %56 = vector.shape_cast %53 : vector<16x128xf32> to vector<1x16x128xf32>
    tpu.vector_store %arg4[%c0_47, %c0_48, %c0_49], %56 {strides = array<i32>} : memref<1x16x128xf32, #tpu.memory_space<vmem>>, vector<1x16x128xf32>,
    return
  }
  func.func @transform_0(%arg0: i32) -> (i32, i32, i32) {
    %c0_i32 = arith.constant 0 : i32
    %c0_i32_0 = arith.constant 0 : i32
    %c0_i32_1 = arith.constant 0 : i32
    return %arg0, %c0_i32, %c0_i32_0 : i32, i32, i32
  }
  func.func @transform_1(%arg0: i32) -> (i32, i32, i32) {
    %c0_i32 = arith.constant 0 : i32
    %c0_i32_0 = arith.constant 0 : i32
    %c0_i32_1 = arith.constant 0 : i32
    %c0_i32_2 = arith.constant 0 : i32
    return %c0_i32, %c0_i32_0, %c0_i32_1 : i32, i32, i32
  }
  func.func @transform_2(%arg0: i32) -> (i32, i32, i32) {
    %c0_i32 = arith.constant 0 : i32
    %c0_i32_0 = arith.constant 0 : i32
    %c0_i32_1 = arith.constant 0 : i32
    %c0_i32_2 = arith.constant 0 : i32
    return %c0_i32, %c0_i32_0, %c0_i32_1 : i32, i32, i32
  }
  func.func @transform_3(%arg0: i32) -> (i32, i32, i32) {
    %c0_i32 = arith.constant 0 : i32
    %c0_i32_0 = arith.constant 0 : i32
    %c0_i32_1 = arith.constant 0 : i32
    return %arg0, %c0_i32, %c0_i32_0 : i32, i32, i32
  }
}

</mosaic_0001>

<bundles_post_ra>
// kernel: tile.13
= control target key start
LH: loop header
LB: loop body
LE: loop exit
PB: predicated region body
PF: predicated region fallthrough
CT: control target
= control target key end

     0   :  { %s28_s0 = inlined_call_operand.vmem [shape: f32[8], index: 0, kind: input, shape index: {}]   ;;  %s29_s1 = inlined_call_operand.vmem [shape: f32[16,8], index: 1, kind: output, shape index: {}]  }
   0x1   :  { %v4_v0 = vld [vmem:[%s28_s0] ss:$0 sm:$0xff] }
   0x2   :  { %5 = vst [vmem:[%s29_s1] sm:$0xff] %v4_v0  ;;  %8 = vst [vmem:[%s29_s1 + $0x8] sm:$0xff] %v4_v0 }

// kernel: tile.18
= control target key start
LH: loop header
LB: loop body
LE: loop exit
PB: predicated region body
PF: predicated region fallthrough
CT: control target
= control target key end

     0   :  { %s131_s10 = smov 120   ;;  %s132_s11 = smov 104   ;;  %vm3_vm0 = vcmask 64512   ;;  %vm9_vm1 = vcmask 1048512   ;;  %vm15_vm2 = vcmask 982912   ;;  %vm21_vm3 = vcmask 917312   ;;  %s207_s0 = inlined_call_operand.vmem [shape: f32[16,8], index: 0, kind: input, shape index: {}]   ;;  %s208_s1 = inlined_call_operand.vmem [shape: f32[1,1,128], index: 1, kind: output, shape index: {}]  }
   0x1   :  { %v101_v0 = vld [vmem:[%s207_s0 + $0xf] sm:$0x1]   ;;  %v103_v1 = vld [vmem:[%s207_s0 + $0xd] sm:$0x1]   ;;  %v102_v2 = vld [vmem:[%s207_s0 + $0xe] sm:$0x1]  }
   0x2   :  { %7 = vrot.lane.b32.xlu0 %v101_v0, %s131_s10  ;;  %19 = vrot.lane.b32.xlu1 %v103_v1, %s132_s11  ;;  %v104_v3 = vld [vmem:[%s207_s0 + $0xc] sm:$0x1]   ;;  %s133_s16 = smov 112   ;;  %s134_s17 = smov 96   ;;  %v105_v4 = vld [vmem:[%s207_s0 + $0xb] sm:$0x1]  }
   0x3   :  { %v106_v5 = vld [vmem:[%s207_s0 + $0xa] sm:$0x1]   ;;  %v2_v6 = vld [vmem:[%s207_s0] sm:$0x1]   ;;  %s135_s24 = smov 88   ;;  %s136_s25 = smov 80  }
   0x4   :  { %4 = vst.msk [vmem:[#allocation0] sm:$0x1] %vm3_vm0, %v2_v6   ;;  %v107_v7 = vld [vmem:[%s207_s0 + $0x9] sm:$0x1]   ;;  %v108_v8 = vld [vmem:[%s207_s0 + $0x8] sm:$0x1]  }
   0x5   :  { %s137_s30 = smov 72   ;;  %s138_s2 = smov 64   ;;  %v109_v9 = vld [vmem:[%s207_s0 + $0x7] sm:$0x1]   ;;  %v110_v10 = vld [vmem:[%s207_s0 + $0x6] sm:$0x1]  }
   0x6   :  { %13 = vrot.lane.b32.xlu0 %v102_v2, %s133_s16  ;;  %25 = vrot.lane.b32.xlu1 %v104_v3, %s134_s17  ;;  %s139_s7 = smov 56   ;;  %s140_s8 = smov 48   ;;  %v111_v11 = vld [vmem:[%s207_s0 + $0x5] sm:$0x1]   ;;  %v112_v12 = vld [vmem:[%s207_s0 + $0x4] sm:$0x1]  }
   0x7   :  { %s141_s13 = smov 40   ;;  %s142_s14 = smov 32   ;;  %v113_v13 = vld [vmem:[%s207_s0 + $0x3] sm:$0x1]   ;;  %v114_v14 = vld [vmem:[%s207_s0 + $0x2] sm:$0x1]  }
   0x8   :  { %s143_s19 = smov 24   ;;  %s144_s20 = smov 16   ;;  %v115_v15 = vld [vmem:[%s207_s0 + $0x1] sm:$0x1]   ;;  %vm27_vm4 = vcmask 851712   ;;  %vm33_vm5 = vcmask 786112  }
   0x9   :  { %s145_s0 = smov 8   ;;  %vm39_vm6 = vcmask 720512   ;;  %vm45_vm7 = vcmask 654912   ;;  %vm51_vm8 = vcmask 589312   ;;  %vm57_vm9 = vcmask 523712  }
   0xa   :  { %31 = vrot.lane.b32.xlu0 %v105_v4, %s135_s24  ;;  %37 = vrot.lane.b32.xlu1 %v106_v5, %s136_s25  ;;  %vm63_vm10 = vcmask 458112   ;;  %vm69_vm11 = vcmask 392512   ;;  %vm75_vm12 = vcmask 326912   ;;  %vm81_vm13 = vcmask 261312  }
   0xb   :  { %vm87_vm14 = vcmask 195712   ;;  %vm93_vm15 = vcmask 130112  }
   0xe   :  { %43 = vrot.lane.b32.xlu0 %v107_v7, %s137_s30  ;;  %49 = vrot.lane.b32.xlu1 %v108_v8, %s138_s2 }
  0x12   :  { %55 = vrot.lane.b32.xlu0 %v109_v9, %s139_s7  ;;  %61 = vrot.lane.b32.xlu1 %v110_v10, %s140_s8 }
  0x16   :  { %67 = vrot.lane.b32.xlu0 %v111_v11, %s141_s13  ;;  %73 = vrot.lane.b32.xlu1 %v112_v12, %s142_s14 }
  0x1a   :  { %79 = vrot.lane.b32.xlu0 %v113_v13, %s143_s19  ;;  %85 = vrot.lane.b32.xlu1 %v114_v14, %s144_s20 }
  0x1e   :  { %91 = vrot.lane.b32.xlu0 %v115_v15, %s145_s0 }
  0x74   :  { %v8_v16 = vpop.permute.xlu0 %7   ;;  %v20_v17 = vpop.permute.xlu1 %19  }
  0x75   :  { %10 = vst.msk [vmem:[#allocation0] sm:$0x1] %vm9_vm1, %v8_v16  }
  0x78   :  { %v14_v18 = vpop.permute.xlu0 %13   ;;  %v26_v19 = vpop.permute.xlu1 %25  }
  0x79   :  { %16 = vst.msk [vmem:[#allocation0] sm:$0x1] %vm15_vm2, %v14_v18  }
  0x7a   :  { %22 = vst.msk [vmem:[#allocation0] sm:$0x1] %vm21_vm3, %v20_v17  }
  0x7b   :  { %28 = vst.msk [vmem:[#allocation0] sm:$0x1] %vm27_vm4, %v26_v19  }
  0x7c   :  { %v32_v20 = vpop.permute.xlu0 %31   ;;  %v38_v21 = vpop.permute.xlu1 %37  }
  0x7d   :  { %34 = vst.msk [vmem:[#allocation0] sm:$0x1] %vm33_vm5, %v32_v20  }
  0x7e   :  { %40 = vst.msk [vmem:[#allocation0] sm:$0x1] %vm39_vm6, %v38_v21  }
  0x80   :  { %v44_v22 = vpop.permute.xlu0 %43   ;;  %v50_v23 = vpop.permute.xlu1 %49  }
  0x81   :  { %46 = vst.msk [vmem:[#allocation0] sm:$0x1] %vm45_vm7, %v44_v22  }
  0x82   :  { %52 = vst.msk [vmem:[#allocation0] sm:$0x1] %vm51_vm8, %v50_v23  }
  0x84   :  { %v56_v24 = vpop.permute.xlu0 %55   ;;  %v62_v25 = vpop.permute.xlu1 %61  }
  0x85   :  { %58 = vst.msk [vmem:[#allocation0] sm:$0x1] %vm57_vm9, %v56_v24  }
  0x86   :  { %64 = vst.msk [vmem:[#allocation0] sm:$0x1] %vm63_vm10, %v62_v25  }
  0x88   :  { %v68_v26 = vpop.permute.xlu0 %67   ;;  %v74_v27 = vpop.permute.xlu1 %73  }
  0x89   :  { %70 = vst.msk [vmem:[#allocation0] sm:$0x1] %vm69_vm11, %v68_v26  }
  0x8a   :  { %76 = vst.msk [vmem:[#allocation0] sm:$0x1] %vm75_vm12, %v74_v27  }
  0x8c   :  { %v80_v28 = vpop.permute.xlu0 %79   ;;  %v86_v29 = vpop.permute.xlu1 %85  }
  0x8d   :  { %82 = vst.msk [vmem:[#allocation0] sm:$0x1] %vm81_vm13, %v80_v28  }
  0x8e   :  { %88 = vst.msk [vmem:[#allocation0] sm:$0x1] %vm87_vm14, %v86_v29  }
  0x90   :  { %v92_v30 = vpop.permute.xlu0 %91  }
  0x91   :  { %94 = vst.msk [vmem:[#allocation0] sm:$0x1] %vm93_vm15, %v92_v30  }
  0x98   :  { %v98_v31 = vld [vmem:[#allocation0] sm:$0x1] }
  0x99   :  { %100 = vst [vmem:[%s208_s1] sm:$0x1] %v98_v31 }

// kernel: stacked_conv_layers_forward.1
= control target key start
LH: loop header
LB: loop body
LE: loop exit
PB: predicated region body
PF: predicated region fallthrough
CT: control target
= control target key end

     0   :  { %s1391_s12 = smov 0   ;;  %s1632_s0 = inlined_call_operand.vmem [shape: bf16[2,16,128], index: 0, kind: input, shape index: {}]   ;;  %s1633_s1 = inlined_call_operand.vmem [shape: bf16[6,128,128], index: 1, kind: input, shape index: {}]   ;;  %s1634_s2 = inlined_call_operand.vmem [shape: f32[2,1,128], index: 2, kind: input, shape index: {}]   ;;  %s1635_s3 = inlined_call_operand.vmem [shape: f32[2,16,128], index: 3, kind: output, shape index: {}]  }
   0x1 LB: > { %s983_s13 = sadd.s32 4294967295, %s1367_s12   ;;  %p987_p0 = scmp.ge.s32.totalorder %s1367_s12, 1  ;;  %s1367_s12 = sphi %s1391_s12, %s13_s12  }
   0x2   : > { %p137_p1 = scmp.lt.s32.totalorder %s1367_s12, 3 }
   0x4   : > { %p138_p2 = pnand %p987_p0, %p137_p1 }
   0x5   : > { %v1312_v0 = vld [vmem:[%s1633_s1 + $0x40] sm:$0xff] (!%p138_p2)   ;;  %v1369_v1 = vmov (!%p138_p2), 0.0   ;;  %v1314_v3 = vld [vmem:[%s1633_s1 + $0x48] sm:$0xff] (!%p138_p2)   ;;  %vm1370_vm0 = vmmov (!%p138_p2), 0   ;;  %p161_p3 = scmp.lt.s32.totalorder (!%p138_p2), %s983_s13, 1  ;;  %v1316_v5 = vld [vmem:[%s1633_s1 + $0x50] sm:$0xff] (!%p138_p2)  }
   0x6   : > { %141 = sbr.rel (%p138_p2) target bundleno = 547 (0x223), region = 32  ;;  %1182 = vmatprep.subr.bf16.mxu0 (!%p138_p2), %v1369_v1  ;;  %1202 = vmatprep.subr.bf16.mxu1 (!%p138_p2), %v1369_v1  ;;  %v1313_v2 = vld [vmem:[%s1633_s1] sm:$0xff] (!%p138_p2)   ;;  %v1315_v4 = vld [vmem:[%s1633_s1 + $0x8] sm:$0xff] (!%p138_p2)   ;;  %v1317_v6 = vld [vmem:[%s1633_s1 + $0x10] sm:$0xff] (!%p138_p2)   ;;  %vm172_vm1 = vcmask (!%p138_p2), 1047559   ;;  %vm178_vm2 = vcmask (!%p138_p2), 1040384  }
   0x7   : > { %1183 = vmatpush3.bf16.msra.mxu0 (!%p138_p2), %v1312_v0  ;;  %1198 = vmatprep.mubr.msk.bf16.mxu0 (!%p138_p2), %vm1370_vm0, %v1369_v1  ;;  %v1318_v7 = vld [vmem:[%s1633_s1 + $0x58] sm:$0xff] (!%p138_p2)   ;;  %v1320_v9 = vld [vmem:[%s1633_s1 + $0x60] sm:$0xff] (!%p138_p2)   ;;  %v1322_v12 = vld [vmem:[%s1633_s1 + $0x68] sm:$0xff] (!%p138_p2)   ;;  %vm173_vm3 = vsmask.f32 (!%p138_p2), 7966 }
   0x8   : > { %1203 = vmatpush3.bf16.msra.mxu1 (!%p138_p2), %v1313_v2  ;;  %1184 = vmatprep.subr.bf16.mxu0 (!%p138_p2), %v1369_v1  ;;  %v1319_v8 = vld [vmem:[%s1633_s1 + $0x18] sm:$0xff] (!%p138_p2)   ;;  %v1321_v10 = vld [vmem:[%s1633_s1 + $0x20] sm:$0xff] (!%p138_p2)   ;;  %vm174_vm4 = vmand (!%p138_p2), %vm172_vm1, %vm173_vm3  ;;  %vm179_vm5 = vsmask.f32 (!%p138_p2), 256  ;;  %vm438_vm7 = vsmask.f32 (!%p138_p2), 7424 }
   0x9   : > { %1204 = vmatprep.subr.bf16.mxu1 (!%p138_p2), %v1369_v1  ;;  %1218 = vmatprep.mubr.msk.bf16.mxu1 (!%p138_p2), %vm1370_vm0, %v1369_v1  ;;  %v175_v13 = vld [vmem:[#allocation2] sm:$0x80] (!%p138_p2)  ;;  %v181_v14 = vld [vmem:[#allocation2 + $0x10] sm:$0x1] (!%p138_p2)  ;;  %v1323_v15 = vld [vmem:[%s1633_s1 + $0x28] sm:$0xff] (!%p138_p2)  }
   0xa   : > { %v176_v16 = vsel (!%p138_p2), %vm174_vm4, 0, %v175_v13  ;;  %vm180_vm6 = vmand (!%p138_p2), %vm178_vm2, %vm179_vm5  ;;  %v1324_v19 = vld [vmem:[%s1633_s1 + $0x70] sm:$0xff] (!%p138_p2)   ;;  %v1326_v23 = vld [vmem:[%s1633_s1 + $0x78] sm:$0xff] (!%p138_p2)  }
   0xb   : > { %1185 = vmatpush3.bf16.msra.mxu0 (!%p138_p2), %v1314_v3  ;;  %177 = vst [vmem:[#allocation2] sm:$0x80] (!%p138_p2), %v176_v16  ;;  %v182_v18 = vsel (!%p138_p2), %vm180_vm6, 0, %v181_v14  ;;  %v1325_v20 = vld [vmem:[%s1633_s1 + $0x30] sm:$0xff] (!%p138_p2)   ;;  %v1327_v24 = vld [vmem:[%s1633_s1 + $0x38] sm:$0xff] (!%p138_p2)   ;;  %v1329_v29 = vld [vmem:[%s1633_s1 + $0x80] sm:$0xff] (!%p138_p2)  }
   0xc   : > { %1205 = vmatpush3.bf16.msra.mxu1 (!%p138_p2), %v1315_v4  ;;  %1186 = vmatprep.subr.bf16.mxu0 (!%p138_p2), %v1369_v1  ;;  %183 = vst [vmem:[#allocation2 + $0x10] sm:$0x1] (!%p138_p2), %v182_v18  ;;  %v1330_v31 = vld [vmem:[%s1633_s1 + $0x88] sm:$0xff] (!%p138_p2)   ;;  %v1331_v32 = vld [vmem:[%s1633_s1 + $0x90] sm:$0xff] (!%p138_p2)   ;;  %v1332_v33 = vld [vmem:[%s1633_s1 + $0x98] sm:$0xff] (!%p138_p2)  }
   0xd   : > { %s1637_s13 = smov (!%p161_p3, %s983_s13), 1  ;;  %1206 = vmatprep.subr.bf16.mxu1 %v1369_v1  ;;  %v1333_v34 = vld [vmem:[%s1633_s1 + $0xa0] sm:$0xff]   ;;  %v1334_v35 = vld [vmem:[%s1633_s1 + $0xa8] sm:$0xff]   ;;  %v1335_v37 = vld [vmem:[%s1633_s1 + $0xb0] sm:$0xff]  }
   0xe   : > { %s1126_s28 = sshll.u32 %s1637_s13, 3  ;;  %v1336_v40 = vld [vmem:[%s1633_s1 + $0xb8] sm:$0xff]   ;;  %v1337_v44 = vld [vmem:[%s1633_s1 + $0x100] sm:$0xff]   ;;  %v1338_v46 = vld [vmem:[%s1633_s1 + $0x108] sm:$0xff]   ;;  %s1127_s18 = sshll.u32 %s1637_s13, 4 }
   0xf   : > { %1187 = vmatpush3.bf16.msra.mxu0 %v1316_v5  ;;  %s165_s6 = scalar_lea.vmem %s1632_s0, %s1126_s28  ;;  %v1340_v45 = vld [vmem:[%s1633_s1 + $0xc0] sm:$0xff]   ;;  %v1339_v47 = vld [vmem:[%s1633_s1 + $0x110] sm:$0xff]   ;;  %v1341_v48 = vld [vmem:[%s1633_s1 + $0x118] sm:$0xff]   ;;  %s170_s21 = scalar_lea.vmem %s1635_s3, %s1127_s18 }
  0x10   : > { %1207 = vmatpush3.bf16.msra.mxu1 %v1317_v6  ;;  %1188 = vmatprep.subr.bf16.mxu0 %v1369_v1  ;;  %v1449_v11 = vld [vmem:[%s165_s6] sm:$0xff]   ;;  %v1342_v49 = vld [vmem:[%s1633_s1 + $0xc8] sm:$0xff]   ;;  %v1344_v51 = vld [vmem:[%s1633_s1 + $0xd0] sm:$0xff]  }
  0x11   : > { %1208 = vmatprep.subr.bf16.mxu1 %v1369_v1  ;;  %v322_v17 = vshrl.u32 %v1449_v11, 16  ;;  %v325_v22 = vshll.u32 %v1449_v11, 16  ;;  %v1343_v50 = vld [vmem:[%s1633_s1 + $0x120] sm:$0xff]   ;;  %v1345_v52 = vld [vmem:[%s1633_s1 + $0x128] sm:$0xff]   ;;  %v1346_v53 = vld [vmem:[%s1633_s1 + $0xd8] sm:$0xff]  }
  0x12   : > { %v193_v25 = vld [vmem:[#allocation2] sm:$0x80]  ;;  %v1347_v54 = vld [vmem:[%s1633_s1 + $0x130] sm:$0xff]   ;;  %v1349_v56 = vld [vmem:[%s1633_s1 + $0x138] sm:$0xff]  }
  0x13   : > { %1189 = vmatpush3.bf16.msra.mxu0 %v1318_v7  ;;  %v324_v21 = vrot.slane %v322_v17, 7  ;;  %v318_v26 = vshrl.u32 %v193_v25, 16  ;;  %v420_v36 = vld [vmem:[#allocation2 + $0x10] sm:$0x1]  ;;  %v444_v38 = vrot.slane %v325_v22, 1  ;;  %v1348_v55 = vld [vmem:[%s1633_s1 + $0xe0] sm:$0xff]  }
  0x14   : > { %1209 = vmatpush3.bf16.msra.mxu1 %v1319_v8  ;;  %1190 = vmatprep.subr.bf16.mxu0 %v1369_v1  ;;  %v447_v39 = vshll.u32 %v420_v36, 16  ;;  %v1350_v57 = vld [vmem:[%s1633_s1 + $0xe8] sm:$0xff]   ;;  %v1351_v58 = vld [vmem:[%s1633_s1 + $0xf0] sm:$0xff]   ;;  %v1353_v59 = vld [vmem:[%s1633_s1 + $0xf8] sm:$0xff]  }
  0x15   : > { %1210 = vmatprep.subr.bf16.mxu1 %v1369_v1  ;;  %v327_v27 = vor.u32 %v325_v22, %v324_v21  ;;  %v320_v28 = vrot.slane %v318_v26, 7  ;;  %v445_v41 = vor.u32 %v444_v38, %v322_v17  ;;  %v1049_v8 = vld [vmem:[%s1634_s2] ss:$0 sm:$0xff]  ;;  %v560_v18 = vld [vmem:[#allocation2] sm:$0x80]  ;;  %v1354_v25 = vld [vmem:[%s1633_s1 + $0x148] sm:$0xff]  }
  0x16   : > { %v449_v42 = vrot.slane %v447_v39, 1  ;;  %v1352_v21 = vld [vmem:[%s1633_s1 + $0x140] sm:$0xff]   ;;  %v1359_v36 = vld [vmem:[%s1633_s1 + $0x170] sm:$0xff]   ;;  %v1360_v39 = vld [vmem:[%s1633_s1 + $0x178] sm:$0xff]  }
  0x17   : > { %1191 = vmatpush3.bf16.msra.mxu0 %v1320_v9  ;;  %v328_v30 = vsel %vm179_vm5, %v320_v28, %v327_v27 }
  0x18   : > { %1211 = vmatpush3.bf16.msra.mxu1 %v1321_v10  ;;  %1192 = vmatprep.subr.bf16.mxu0 %v1369_v1  ;;  %v450_v43 = vsel %vm438_vm7, %v445_v41, %v449_v42 }
  0x19   : > { %1212 = vmatprep.subr.bf16.mxu1 %v1369_v1 }
  0x1b   : > { %1193 = vmatpush3.bf16.msra.mxu0 %v1322_v12 }
  0x1c   : > { %1213 = vmatpush3.bf16.msra.mxu1 %v1323_v15  ;;  %1194 = vmatprep.subr.bf16.mxu0 %v1369_v1 }
  0x1d   : > { %1214 = vmatprep.subr.bf16.mxu1 %v1369_v1 }
  0x1f   : > { %1195 = vmatpush3.bf16.msra.mxu0 %v1324_v19 }
  0x20   : > { %1215 = vmatpush3.bf16.msra.mxu1 %v1325_v20  ;;  %1196 = vmatprep.subr.bf16.mxu0 %v1369_v1 }
  0x21   : > { %1216 = vmatprep.subr.bf16.mxu1 %v1369_v1 }
  0x23   : > { %1197 = vmatpush3.bf16.msra.mxu0 %v1326_v23  ;;  %v686_v23 = vshrl.u32 %v560_v18, 16 }
  0x24   : > { %1217 = vmatpush3.bf16.msra.mxu1 %v1327_v24  ;;  %1222 = vmatprep.subr.bf16.mxu0 %v1369_v1 }
  0x25   : > { %1242 = vmatprep.subr.bf16.mxu1 %v1369_v1  ;;  %v688_v28 = vrot.slane %v686_v23, 7 }
  0x26   : > { %1199 = vmatmul.mubr.bf16.vlgmr.msra.gmra.mrb[0].mxu0 %v1449_v11 }
  0x27   : > { %1219 = vmatmul.mubr.bf16.vlgmr.msra.gmra.mrb[0].mxu1 %v328_v30  ;;  %1223 = vmatpush3.bf16.msra.mxu0 %v1329_v29  ;;  %v1355_v30 = vld [vmem:[%s1633_s1 + $0x150] sm:$0xff]  }
  0x28   : > { %1224 = vmatprep.subr.bf16.mxu0 %v1369_v1  ;;  %1238 = vmatprep.mubr.msk.bf16.mxu0 %vm1370_vm0, %v1369_v1 }
  0x29   : > { %1258 = vmatprep.mubr.msk.bf16.mxu1 %vm1370_vm0, %v1369_v1  ;;  %1243 = vmatpush3.bf16.msra.mxu1 %v1337_v44 }
  0x2a   : > { %1244 = vmatprep.subr.bf16.mxu1 %v1369_v1 }
  0x2b   : > { %1225 = vmatpush3.bf16.msra.mxu0 %v1330_v31 }
  0x2c   : > { %1226 = vmatprep.subr.bf16.mxu0 %v1369_v1 }
  0x2d   : > { %1245 = vmatpush3.bf16.msra.mxu1 %v1338_v46 }
  0x2e   : > { %1246 = vmatprep.subr.bf16.mxu1 %v1369_v1 }
  0x2f   : > { %1227 = vmatpush3.bf16.msra.mxu0 %v1331_v32  ;;  %v1356_v32 = vld [vmem:[%s1633_s1 + $0x158] sm:$0xff]  }
  0x30   : > { %1228 = vmatprep.subr.bf16.mxu0 %v1369_v1 }
  0x31   : > { %1247 = vmatpush3.bf16.msra.mxu1 %v1339_v47 }
  0x32   : > { %1248 = vmatprep.subr.bf16.mxu1 %v1369_v1 }
  0x33   : > { %1229 = vmatpush3.bf16.msra.mxu0 %v1332_v33  ;;  %v1357_v33 = vld [vmem:[%s1633_s1 + $0x160] sm:$0xff]  }
  0x34   : > { %1230 = vmatprep.subr.bf16.mxu0 %v1369_v1 }
  0x35   : > { %1249 = vmatpush3.bf16.msra.mxu1 %v1341_v48 }
  0x36   : > { %1250 = vmatprep.subr.bf16.mxu1 %v1369_v1 }
  0x37   : > { %1231 = vmatpush3.bf16.msra.mxu0 %v1333_v34  ;;  %v1358_v34 = vld [vmem:[%s1633_s1 + $0x168] sm:$0xff]  }
  0x38   : > { %1232 = vmatprep.subr.bf16.mxu0 %v1369_v1 }
  0x39   : > { %1251 = vmatpush3.bf16.msra.mxu1 %v1343_v50 }
  0x3a   : > { %1252 = vmatprep.subr.bf16.mxu1 %v1369_v1 }
  0x3b   : > { %1233 = vmatpush3.bf16.msra.mxu0 %v1334_v35  ;;  %v788_v35 = vld [vmem:[#allocation2 + $0x10] sm:$0x1] }
  0x3c   : > { %1234 = vmatprep.subr.bf16.mxu0 %v1369_v1  ;;  %v814_v38 = vshll.u32 %v788_v35, 16 }
  0x3d   : > { %1253 = vmatpush3.bf16.msra.mxu1 %v1345_v52 }
  0x3e   : > { %1254 = vmatprep.subr.bf16.mxu1 %v1369_v1  ;;  %v816_v41 = vrot.slane %v814_v38, 1 }
  0x3f   : > { %1235 = vmatpush3.bf16.msra.mxu0 %v1335_v37 }
  0x40   : > { %1236 = vmatprep.subr.bf16.mxu0 %v1369_v1 }
  0x41   : > { %1255 = vmatpush3.bf16.msra.mxu1 %v1347_v54 }
  0x42   : > { %1256 = vmatprep.subr.bf16.mxu1 %v1369_v1 }
  0x43   : > { %1237 = vmatpush3.bf16.msra.mxu0 %v1336_v40 }
  0x44   : > { %1262 = vmatprep.subr.bf16.mxu0 %v1369_v1 }
  0x45   : > { %1257 = vmatpush3.bf16.msra.mxu1 %v1349_v56 }
  0x46   : > { %1239 = vmatmul.mubr.bf16.vlgmr.msra.gmra.mrb[4].mxu0 %v450_v43  ;;  %1282 = vmatprep.subr.bf16.mxu1 %v1369_v1 }
  0x47   : > { %1278 = vmatprep.mubr.msk.bf16.mxu0 %vm1370_vm0, %v1369_v1  ;;  %1263 = vmatpush3.bf16.msra.mxu0 %v1340_v45 }
  0x48   : > { %1264 = vmatprep.subr.bf16.mxu0 %v1369_v1 }
  0x4b   : > { %1265 = vmatpush3.bf16.msra.mxu0 %v1342_v49 }
  0x4c   : > { %1266 = vmatprep.subr.bf16.mxu0 %v1369_v1 }
  0x4f   : > { %1267 = vmatpush3.bf16.msra.mxu0 %v1344_v51 }
  0x50   : > { %1268 = vmatprep.subr.bf16.mxu0 %v1369_v1 }
  0x53   : > { %1269 = vmatpush3.bf16.msra.mxu0 %v1346_v53 }
  0x54   : > { %1270 = vmatprep.subr.bf16.mxu0 %v1369_v1 }
  0x57   : > { %1271 = vmatpush3.bf16.msra.mxu0 %v1348_v55 }
  0x58   : > { %1272 = vmatprep.subr.bf16.mxu0 %v1369_v1 }
  0x5b   : > { %1273 = vmatpush3.bf16.msra.mxu0 %v1350_v57 }
  0x5c   : > { %1274 = vmatprep.subr.bf16.mxu0 %v1369_v1 }
  0x5f   : > { %1275 = vmatpush3.bf16.msra.mxu0 %v1351_v58 }
  0x60   : > { %1276 = vmatprep.subr.bf16.mxu0 %v1369_v1 }
  0x63   : > { %1277 = vmatpush3.bf16.msra.mxu0 %v1353_v59 }
  0xf9   : > { %v310_v60 = vpop.f32.mrb[0].mxu0 }
  0xfa   : > { %v412_v61 = vpop.f32.mrb[0].mxu1  ;;  %v1200_v62 = vpop.f32.mrb[1].mxu0 }
  0xfb   : > { %v413_v63 = vadd.f32 %v412_v61, %v310_v60  ;;  %v1220_v0 = vpop.f32.mrb[1].mxu1  ;;  %v313_v2 = vpop.f32.mrb[2].mxu0 }
  0xfc   : > { %v415_v3 = vpop.f32.mrb[2].mxu1  ;;  %v1201_v4 = vpop.f32.mrb[3].mxu0 }
  0xfd   : > { %v416_v5 = vadd.f32 %v415_v3, %v313_v2  ;;  %v1221_v6 = vpop.f32.mrb[3].mxu1 }
 0x119   : > { %v534_v7 = vpop.f32.mrb[4].mxu0 }
 0x11a   : > { %v541_v9 = vadd.f32 %v534_v7, %v413_v63  ;;  %v1240_v10 = vpop.f32.mrb[5].mxu0 }
 0x11b   : > { %v537_v11 = vpop.f32.mrb[6].mxu0 }
 0x11c   : > { %v550_v12 = vadd.f32 %v1049_v8, %v541_v9  ;;  %v542_v13 = vadd.f32 %v537_v11, %v416_v5  ;;  %v1241_v14 = vpop.f32.mrb[7].mxu0 }
 0x11e   : > { %v554_v15 = vmul.f32 0.01, %v550_v12  ;;  %v551_v16 = vadd.f32 %v1049_v8, %v542_v13  ;;  %vm552_vm8 = vcmp.ge.f32.partialorder %v550_v12, 0.0 }
 0x120   : > { %vm553_vm9 = vcmp.ge.f32.partialorder %v551_v16, 0.0  ;;  %v555_v17 = vmul.f32 0.01, %v551_v16  ;;  %v556_v19 = vsel %vm552_vm8, %v550_v12, %v554_v15 }
 0x122   : > { %v557_v20 = vsel %vm553_vm9, %v551_v16, %v555_v17 }
 0x123   : > { %v558_v22 = vpack.c.bf16 %v557_v20, %v556_v19 }
 0x125   : > { %1259 = vmatmul.mubr.bf16.vlgmr.msra.gmra.mrb[4].mxu1 %v558_v22  ;;  %v690_v24 = vshrl.u32 %v558_v22, 16  ;;  %v693_v27 = vshll.u32 %v558_v22, 16 }
 0x126   : > { %1283 = vmatpush3.bf16.msra.mxu1 %v1352_v21  ;;  %1298 = vmatprep.mubr.msk.bf16.mxu1 %vm1370_vm0, %v1369_v1 }
 0x127   : > { %v692_v26 = vrot.slane %v690_v24, 7  ;;  %1284 = vmatprep.subr.bf16.mxu1 %v1369_v1  ;;  %v811_v37 = vrot.slane %v693_v27, 1 }
 0x129   : > { %v695_v29 = vor.u32 %v693_v27, %v692_v26  ;;  %v812_v40 = vor.u32 %v811_v37, %v690_v24 }
 0x12a   : > { %1285 = vmatpush3.bf16.msra.mxu1 %v1354_v25 }
 0x12b   : > { %v696_v31 = vsel %vm179_vm5, %v688_v28, %v695_v29  ;;  %1286 = vmatprep.subr.bf16.mxu1 %v1369_v1  ;;  %v817_v42 = vsel %vm438_vm7, %v812_v40, %v816_v41 }
 0x12c   : > { %1279 = vmatmul.mubr.bf16.vlgmr.msra.gmra.mrb[8].mxu0 %v696_v31 }
 0x12e   : > { %1287 = vmatpush3.bf16.msra.mxu1 %v1355_v30 }
 0x12f   : > { %1288 = vmatprep.subr.bf16.mxu1 %v1369_v1 }
 0x132   : > { %1289 = vmatpush3.bf16.msra.mxu1 %v1356_v32 }
 0x133   : > { %1290 = vmatprep.subr.bf16.mxu1 %v1369_v1 }
 0x136   : > { %1291 = vmatpush3.bf16.msra.mxu1 %v1357_v33 }
 0x137   : > { %1292 = vmatprep.subr.bf16.mxu1 %v1369_v1 }
 0x13a   : > { %1293 = vmatpush3.bf16.msra.mxu1 %v1358_v34 }
 0x13b   : > { %1294 = vmatprep.subr.bf16.mxu1 %v1369_v1 }
 0x13e   : > { %1295 = vmatpush3.bf16.msra.mxu1 %v1359_v36 }
 0x13f   : > { %1296 = vmatprep.subr.bf16.mxu1 %v1369_v1  ;;  %v1123_v1 = vld [vmem:[%s1634_s2 + $0x1] ss:$0 sm:$0xff] }
 0x142   : > { %1297 = vmatpush3.bf16.msra.mxu1 %v1360_v39 }
 0x145   : > { %1299 = vmatmul.mubr.bf16.vlgmr.msra.gmra.mrb[8].mxu1 %v817_v42 }
 0x1f8   : > { %v678_v43 = vpop.f32.mrb[4].mxu1 }
 0x1f9   : > { %v1260_v44 = vpop.f32.mrb[5].mxu1 }
 0x1fa   : > { %v681_v45 = vpop.f32.mrb[6].mxu1 }
 0x1fb   : > { %v1261_v46 = vpop.f32.mrb[7].mxu1 }
 0x1ff   : > { %v780_v47 = vpop.f32.mrb[8].mxu0 }
 0x200   : > { %v781_v48 = vadd.f32 %v780_v47, %v678_v43  ;;  %v1280_v49 = vpop.f32.mrb[9].mxu0 }
 0x201   : > { %v783_v50 = vpop.f32.mrb[10].mxu0 }
 0x202   : > { %v784_v51 = vadd.f32 %v783_v50, %v681_v45  ;;  %v1281_v52 = vpop.f32.mrb[11].mxu0 }
 0x218   : > { %v901_v53 = vpop.f32.mrb[8].mxu1 }
 0x219   : > { %v908_v54 = vadd.f32 %v901_v53, %v781_v48  ;;  %v1300_v55 = vpop.f32.mrb[9].mxu1 }
 0x21a   : > { %v904_v56 = vpop.f32.mrb[10].mxu1 }
 0x21b   : > { %v918_v57 = vadd.f32 %v1123_v1, %v908_v54  ;;  %v909_v58 = vadd.f32 %v904_v56, %v784_v51  ;;  %v1301_v59 = vpop.f32.mrb[11].mxu1 }
 0x21d   : > { %vm920_vm10 = vcmp.ge.f32.partialorder %v918_v57, 0.0  ;;  %v922_v60 = vmul.f32 0.01, %v918_v57  ;;  %v919_v61 = vadd.f32 %v1123_v1, %v909_v58 }
 0x21f   : > { %v924_v62 = vsel %vm920_vm10, %v918_v57, %v922_v60  ;;  %vm921_vm11 = vcmp.ge.f32.partialorder %v919_v61, 0.0  ;;  %v923_v63 = vmul.f32 0.01, %v919_v61 }
 0x220   : > { %926 = vst [vmem:[%s170_s21] sm:$0xff] %v924_v62 }
 0x221   : > { %v925_v0 = vsel %vm921_vm11, %v919_v61, %v923_v63 }
 0x222   : > { %927 = vst [vmem:[%s170_s21 + $0x8] sm:$0xff] %v925_v0 }
 0x223 PF: > { %s13_s12 = sadd.s32 1, %s1367_s12  }
 0x224   : > { %p10_p4 = scmp.ge.s32.totalorder %s13_s12, 4  }
 0x226   :  { %12 = sbr.rel (!%p10_p4) target bundleno = 1 (0x1), region = 68 }

</bundles_post_ra>
